<compile_context>
chip_gen: v6e
topology: v6e:2x2x1
jax: 0.10.0
libtpu: 0.0.40
codegen_flags: <defaults>
</compile_context>

<pallas_src>
import functools

import jax
import jax.numpy as jnp
from jax import lax
from jax.experimental import pallas as pl
from jax.experimental.pallas import tpu as pltpu


def _inverted_residual_kernel(*refs, W, use_res, expand, small_cin):
    # refs = (x, [w1, b1,] dw, b2, w3, b3, masks, out)
    x_ref = refs[0]
    i = 1
    if expand:
        w1_ref, b1_ref = refs[i], refs[i + 1]
        i += 2
    dw_ref, b2_ref, w3_ref, b3_ref, mask_ref = refs[i:i + 5]
    o_ref = refs[-1]

    x = x_ref[0]                                     # (Cin, H*W)  bf16
    cin, hw = x.shape

    # ---- 1x1 expand conv (BN scale folded into w1) + bias + ReLU6 ----------
    if expand:
        if small_cin:
            # K = Cin is tiny: an MXU contraction would be <4% utilized and
            # drain-latency bound -> do Cin broadcast-FMAs on the VPU instead.
            xf = x.astype(jnp.float32)               # (Cin, H*W)
            w1 = w1_ref[...].astype(jnp.float32)     # (Chid, Cin)
            acc = w1[:, 0:1] * xf[0:1, :]
            for c in range(1, cin):
                acc = acc + w1[:, c:c + 1] * xf[c:c + 1, :]
        else:
            acc = jnp.dot(w1_ref[...], x, preferred_element_type=jnp.float32)
        y = jnp.clip(acc + b1_ref[...], 0.0, 6.0)    # (Chid, H*W) f32
    else:
        y = x.astype(jnp.float32)                    # hidden_dim == Cin

    # ---- 3x3 depthwise conv, pad=1: 4 lane rolls + host-built masks --------
    # mask rows: 0: col>=1, 1: col<=W-2, 2: row>=1, 3: row<=H-2  (f32 0/1)
    masks = mask_ref[...]                            # (4, H*W)
    col_m1 = masks[0:1, :]
    col_p1 = masks[1:2, :]
    row_m1 = masks[2:3, :]
    row_p1 = masks[3:4, :]

    taps = dw_ref[...]                               # (Chid, 9) f32, BN2 folded

    # Horizontal neighbours, shared across the three kernel rows.
    left = pltpu.roll(y, shift=1, axis=1) * col_m1       # y[r, c-1] (0 at c=0)
    right = pltpu.roll(y, shift=hw - 1, axis=1) * col_p1  # y[r, c+1] (0 at c=W-1)

    # Horizontal partials h_dh[r, c] = sum_dw tap[dh, dw] * y[r, c+dw]
    h_m1 = taps[:, 0:1] * left + taps[:, 1:2] * y + taps[:, 2:3] * right
    h_0 = taps[:, 3:4] * left + taps[:, 4:5] * y + taps[:, 5:6] * right
    h_p1 = taps[:, 6:7] * left + taps[:, 7:8] * y + taps[:, 8:9] * right

    # Vertical combine: out[r, c] = h_m1[r-1, c] + h_0[r, c] + h_p1[r+1, c]
    acc = h_0
    acc = acc + pltpu.roll(h_m1, shift=W, axis=1) * row_m1
    acc = acc + pltpu.roll(h_p1, shift=hw - W, axis=1) * row_p1

    z = jnp.clip(acc + b2_ref[...], 0.0, 6.0)        # (Chid, H*W) f32

    # ---- 1x1 projection conv (BN scale folded into w3) + bias --------------
    # If w3 arrives as bf16 (bf16_project), z is cast to match -> bf16 x bf16
    # MXU inputs with f32 accumulation.  Stride-2 subsampling is done by the
    # wrapper (pointwise ops commute with it), keeping this store lane-dense.
    out = jnp.dot(w3_ref[...], z.astype(w3_ref.dtype),
                  preferred_element_type=jnp.float32) + b3_ref[...]

    if use_res:
        out = out + x.astype(jnp.float32)

    o_ref[0] = out.astype(o_ref.dtype)               # (Cout, H*W) lane-dense


def _make_boundary_masks(H, W):
    """(4, H*W) f32 0/1 masks: [col>=1, col<=W-2, row>=1, row<=H-2]."""
    pos = jnp.arange(H * W)
    row = pos // W
    col = pos % W
    return jnp.stack([col >= 1, col <= W - 2,
                      row >= 1, row <= H - 2]).astype(jnp.float32)


def _vmem_limit_bytes():
    """~half of physical VMEM per generation (32 MiB v7x, 64 MiB v5e/v6e)."""
    try:
        cap = getattr(pltpu.get_tpu_info(), "vmem_capacity_bytes", None)
        if cap:
            return int(min(max(cap // 2, 32 * 1024 * 1024), 100 * 1024 * 1024))
    except Exception:
        pass
    return 32 * 1024 * 1024


def inverted_residual_forward(x_nchw, p, *, stride, expand_ratio,
                              bf16_project=True):
    """Forward pass matching torch InvertedResidual.forward (NCHW in/out)."""
    N, Cin, H, W = x_nchw.shape
    Cout = p["w3_k"].shape[0]
    HW = H * W
    use_res = (stride == 1 and Cin == Cout)
    expand = (expand_ratio != 1)
    out_dtype = x_nchw.dtype

    # NCHW -> (N, C, H*W): pure reshape (no transpose / no extra HBM pass);
    # bf16 halves the activation DMA bytes and is the MXU-native input type.
    x_flat = x_nchw.reshape(N, Cin, HW).astype(jnp.bfloat16)

    w3 = p["w3_k"].astype(jnp.bfloat16) if bf16_project else p["w3_k"]

    args = [x_flat]
    if expand:
        args += [p["w1_k"], p["b1_k"]]
    args += [p["dw_k"], p["b2_k"], w3, p["b3_k"], _make_boundary_masks(H, W)]

    def const_spec(a):
        nd = a.ndim
        # Invariant operand: same block index every grid step, so it stays
        # VMEM-resident.  (pipeline_mode=pl.Buffered(1) would additionally
        # drop its double buffer; negligible at these sizes, worthwhile at
        # DeepLab-scale weights.)
        return pl.BlockSpec(a.shape, lambda n, _nd=nd: (0,) * _nd)

    kernel = functools.partial(
        _inverted_residual_kernel,
        W=W, use_res=use_res, expand=expand, small_cin=(Cin <= 8))

    out_flat = pl.pallas_call(
        kernel,
        out_shape=jax.ShapeDtypeStruct((N, Cout, HW), out_dtype),
        grid_spec=pltpu.PrefetchScalarGridSpec(
            num_scalar_prefetch=0,
            grid=(N,),
            in_specs=[pl.BlockSpec((1, Cin, HW), lambda n: (n, 0, 0))]
                     + [const_spec(a) for a in args[1:]],
            out_specs=pl.BlockSpec((1, Cout, HW), lambda n: (n, 0, 0))),
        compiler_params=pltpu.CompilerParams(
            dimension_semantics=("parallel",),
            vmem_limit_bytes=_vmem_limit_bytes()),
    )(*args)

    # (N, Cout, H*W) is already flattened NCHW: reshape only, no transpose.
    out = out_flat.reshape(N, Cout, H, W)
    if stride != 1:
        # Exact: bias / ReLU6 / 1x1 projection are pointwise in space, so a
        # full-resolution compute followed by a strided slice equals the
        # strided depthwise conv.  This replaces the old dense (HW, HoWo)
        # selection matmul (largest flop term, O(HW*HoWo) memory).
        out = out[:, :, ::stride, ::stride]
    return out


def init_params(key, inp, oup, expand_ratio):
    """Deterministic synthetic parameters (shapes from InvertedResidual.__init__)."""
    hidden = int(round(inp * expand_ratio))
    eps = 1e-5
    ks = jax.random.split(key, 16)

    def bn_fold(kg, kb, km, kv, c):
        gamma = jax.random.uniform(kg, (c,), minval=0.5, maxval=1.5)
        beta = jax.random.normal(kb, (c,)) * 0.1
        mean = jax.random.normal(km, (c,)) * 0.1
        var = jax.random.uniform(kv, (c,), minval=0.5, maxval=1.5)
        scale = gamma / jnp.sqrt(var + eps)
        bias = beta - mean * scale
        return scale.astype(jnp.float32), bias.astype(jnp.float32)

    # PyTorch-shaped conv weights (OIHW).
    w1_oihw = (jax.random.normal(ks[0], (hidden, inp, 1, 1)) * 0.2).astype(jnp.float32)
    dw_oihw = (jax.random.normal(ks[1], (hidden, 1, 3, 3)) * 0.2).astype(jnp.float32)
    w3_oihw = (jax.random.normal(ks[2], (oup, hidden, 1, 1)) * 0.2).astype(jnp.float32)

    s1, b1 = bn_fold(ks[3], ks[4], ks[5], ks[6], hidden)
    s2, b2 = bn_fold(ks[7], ks[8], ks[9], ks[10], hidden)
    s3, b3 = bn_fold(ks[11], ks[12], ks[13], ks[14], oup)

    # Fold BN scales into the conv weights (per output channel).  w1 and w3
    # are additionally rounded to bf16-representable values so the kernel's
    # bf16 MXU paths see exactly the same weight numbers as the f32 reference.
    w1f = (w1_oihw * s1[:, None, None, None]).astype(jnp.bfloat16).astype(jnp.float32)
    dwf = dw_oihw * s2[:, None, None, None]
    w3f = (w3_oihw * s3[:, None, None, None]).astype(jnp.bfloat16).astype(jnp.float32)

    return {
        # kernel-layout (channels-first, BN-scale-folded) parameters
        "w1_k": w1f[:, :, 0, 0].astype(jnp.bfloat16),   # (hidden, inp)  bf16
        "b1_k": b1[:, None],                            # (hidden, 1)
        "dw_k": dwf[:, 0].reshape(hidden, 9),           # (hidden, 9) taps, kh-major
        "b2_k": b2[:, None],                            # (hidden, 1)
        "w3_k": w3f[:, :, 0, 0],                        # (oup, hidden) f32 (bf16-representable)
        "b3_k": b3[:, None],                            # (oup, 1)
        # torch-layout folded weights for the pure-JAX reference
        "w1_oihw": w1f, "dw_oihw": dwf, "w3_oihw": w3f,
        "b1": b1, "b2": b2, "b3": b3,
    }


def reference_nchw(x, p, stride, expand_ratio):
    """Pure-JAX reference mirroring the PyTorch forward (BN folded into weights)."""
    dn = ("NCHW", "OIHW", "NCHW")
    y = x
    if expand_ratio != 1:
        y = lax.conv_general_dilated(y, p["w1_oihw"], (1, 1), "VALID",
                                     dimension_numbers=dn)
        y = y + p["b1"][None, :, None, None]
        y = jnp.clip(y, 0.0, 6.0)
    hidden = p["dw_oihw"].shape[0]
    y = lax.conv_general_dilated(y, p["dw_oihw"], (stride, stride),
                                 ((1, 1), (1, 1)), dimension_numbers=dn,
                                 feature_group_count=hidden)
    y = y + p["b2"][None, :, None, None]
    y = jnp.clip(y, 0.0, 6.0)
    y = lax.conv_general_dilated(y, p["w3_oihw"], (1, 1), "VALID",
                                 dimension_numbers=dn)
    y = y + p["b3"][None, :, None, None]
    if stride == 1 and x.shape[1] == y.shape[1]:
        y = y + x
    return y


if __name__ == "__main__":
    key = jax.random.PRNGKey(0)
    N, H, W = 2, 16, 16
    configs = [
        # (inp, oup, stride, expand_ratio)
        (4, 4, 1, 6),   # expand + residual path (primary config)
        (4, 8, 2, 6),   # strided, no residual
        (4, 4, 1, 1),   # expand_ratio == 1 path, residual
    ]

    for inp, oup, stride, expand_ratio in configs:
        kx, kp, key = jax.random.split(key, 3)
        x = jax.random.normal(kx, (N, inp, H, W), dtype=jnp.float32)
        # bf16-representable inputs so the kernel's bf16 DMA/MXU path is lossless
        x = x.astype(jnp.bfloat16).astype(jnp.float32)
        params = init_params(kp, inp, oup, expand_ratio)

        ref = jax.block_until_ready(reference_nchw(x, params, stride, expand_ratio))
        Ho = (H - 1) // stride + 1
        Wo = (W - 1) // stride + 1

        # Exact f32-projection mode at tight tolerance; bf16-projection mode
        # (v6e/v7x MXU fast path) at a looser tolerance that bounds the bf16
        # rounding of the ReLU6-clipped intermediate z.
        for bf16_project, atol, rtol in ((False, 1e-3, 1e-3),
                                         (True, 5e-2, 2e-2)):
            out = inverted_residual_forward(x, params, stride=stride,
                                            expand_ratio=expand_ratio,
                                            bf16_project=bf16_project)
            out = jax.block_until_ready(out)
            assert out.shape == ref.shape == (N, oup, Ho, Wo)
            assert jnp.allclose(out, ref, atol=atol, rtol=rtol), (
                bf16_project, float(jnp.max(jnp.abs(out - ref))))

    print("KERNEL_OK")
</pallas_src>

<mosaic_0001>
module attributes {stable_mosaic.version = 11 : i64} {
  func.func @_inverted_residual_kernel(%arg0: i32, %arg1: memref<1x4x256xbf16, #tpu.memory_space<vmem>>, %arg2: memref<24x4xbf16, #tpu.memory_space<vmem>>, %arg3: memref<24x1xf32, #tpu.memory_space<vmem>>, %arg4: memref<24x9xf32, #tpu.memory_space<vmem>>, %arg5: memref<24x1xf32, #tpu.memory_space<vmem>>, %arg6: memref<4x24xf32, #tpu.memory_space<vmem>>, %arg7: memref<4x1xf32, #tpu.memory_space<vmem>>, %arg8: memref<4x256xf32, #tpu.memory_space<vmem>>, %arg9: memref<1x4x256xf32, #tpu.memory_space<vmem>>) attributes {dimension_semantics = [#tpu.dimension_semantics<parallel>], iteration_bounds = array<i64: 2>, scalar_prefetch = 0 : i64, scratch_operands = 0 : i64, tpu.core_type = #tpu.core_type<tc>, window_params = [{transform_indices = @transform_0, window_bounds = array<i64: 1, 4, 256>}, {pipeline_mode = #tpu.pipeline_mode<synchronous>, transform_indices = @transform_1, window_bounds = array<i64: 24, 4>}, {pipeline_mode = #tpu.pipeline_mode<synchronous>, transform_indices = @transform_2, window_bounds = array<i64: 24, 1>}, {pipeline_mode = #tpu.pipeline_mode<synchronous>, transform_indices = @transform_3, window_bounds = array<i64: 24, 9>}, {pipeline_mode = #tpu.pipeline_mode<synchronous>, transform_indices = @transform_4, window_bounds = array<i64: 24, 1>}, {pipeline_mode = #tpu.pipeline_mode<synchronous>, transform_indices = @transform_5, window_bounds = array<i64: 4, 24>}, {pipeline_mode = #tpu.pipeline_mode<synchronous>, transform_indices = @transform_6, window_bounds = array<i64: 4, 1>}, {pipeline_mode = #tpu.pipeline_mode<synchronous>, transform_indices = @transform_7, window_bounds = array<i64: 4, 256>}, {transform_indices = @transform_8, window_bounds = array<i64: 1, 4, 256>}]} {
    %c0 = arith.constant 0 : index
    %c0_0 = arith.constant 0 : index
    %c0_1 = arith.constant 0 : index
    %0 = vector.load %arg1[%c0, %c0_0, %c0_1] : memref<1x4x256xbf16, #tpu.memory_space<vmem>>, vector<1x4x256xbf16>
    %1 = vector.shape_cast %0 : vector<1x4x256xbf16> to vector<4x256xbf16>
    %2 = arith.extf %1 : vector<4x256xbf16> to vector<4x256xf32>
    %c0_2 = arith.constant 0 : index
    %c0_3 = arith.constant 0 : index
    %3 = vector.load %arg2[%c0_2, %c0_3] : memref<24x4xbf16, #tpu.memory_space<vmem>>, vector<24x4xbf16>
    %4 = arith.extf %3 : vector<24x4xbf16> to vector<24x4xf32>
    %5 = vector.extract_strided_slice %4 {offsets = [0, 0], sizes = [24, 1], strides = [1, 1]} : vector<24x4xf32> to vector<24x1xf32>
    %6 = vector.extract_strided_slice %2 {offsets = [0, 0], sizes = [1, 256], strides = [1, 1]} : vector<4x256xf32> to vector<1x256xf32>
    %7 = vector.broadcast %5 : vector<24x1xf32> to vector<24x256xf32>
    %8 = vector.broadcast %6 : vector<1x256xf32> to vector<24x256xf32>
    %9 = arith.mulf %7, %8 : vector<24x256xf32>
    %10 = vector.extract_strided_slice %4 {offsets = [0, 1], sizes = [24, 1], strides = [1, 1]} : vector<24x4xf32> to vector<24x1xf32>
    %11 = vector.extract_strided_slice %2 {offsets = [1, 0], sizes = [1, 256], strides = [1, 1]} : vector<4x256xf32> to vector<1x256xf32>
    %12 = vector.broadcast %10 : vector<24x1xf32> to vector<24x256xf32>
    %13 = vector.broadcast %11 : vector<1x256xf32> to vector<24x256xf32>
    %14 = arith.mulf %12, %13 : vector<24x256xf32>
    %15 = arith.addf %9, %14 : vector<24x256xf32>
    %16 = vector.extract_strided_slice %4 {offsets = [0, 2], sizes = [24, 1], strides = [1, 1]} : vector<24x4xf32> to vector<24x1xf32>
    %17 = vector.extract_strided_slice %2 {offsets = [2, 0], sizes = [1, 256], strides = [1, 1]} : vector<4x256xf32> to vector<1x256xf32>
    %18 = vector.broadcast %16 : vector<24x1xf32> to vector<24x256xf32>
    %19 = vector.broadcast %17 : vector<1x256xf32> to vector<24x256xf32>
    %20 = arith.mulf %18, %19 : vector<24x256xf32>
    %21 = arith.addf %15, %20 : vector<24x256xf32>
    %22 = vector.extract_strided_slice %4 {offsets = [0, 3], sizes = [24, 1], strides = [1, 1]} : vector<24x4xf32> to vector<24x1xf32>
    %23 = vector.extract_strided_slice %2 {offsets = [3, 0], sizes = [1, 256], strides = [1, 1]} : vector<4x256xf32> to vector<1x256xf32>
    %24 = vector.broadcast %22 : vector<24x1xf32> to vector<24x256xf32>
    %25 = vector.broadcast %23 : vector<1x256xf32> to vector<24x256xf32>
    %26 = arith.mulf %24, %25 : vector<24x256xf32>
    %27 = arith.addf %21, %26 : vector<24x256xf32>
    %c0_4 = arith.constant 0 : index
    %c0_5 = arith.constant 0 : index
    %28 = vector.load %arg3[%c0_4, %c0_5] : memref<24x1xf32, #tpu.memory_space<vmem>>, vector<24x1xf32>
    %29 = vector.broadcast %28 : vector<24x1xf32> to vector<24x256xf32>
    %30 = arith.addf %27, %29 : vector<24x256xf32>
    %cst = arith.constant 0.000000e+00 : f32
    %cst_6 = arith.constant 6.000000e+00 : f32
    %31 = vector.broadcast %cst : f32 to vector<24x256xf32>
    %32 = arith.maximumf %31, %30 : vector<24x256xf32>
    %33 = vector.broadcast %cst_6 : f32 to vector<24x256xf32>
    %34 = arith.minimumf %33, %32 : vector<24x256xf32>
    %c0_7 = arith.constant 0 : index
    %c0_8 = arith.constant 0 : index
    %35 = vector.load %arg8[%c0_7, %c0_8] : memref<4x256xf32, #tpu.memory_space<vmem>>, vector<4x256xf32>
    %36 = vector.extract_strided_slice %35 {offsets = [0, 0], sizes = [1, 256], strides = [1, 1]} : vector<4x256xf32> to vector<1x256xf32>
    %37 = vector.extract_strided_slice %35 {offsets = [1, 0], sizes = [1, 256], strides = [1, 1]} : vector<4x256xf32> to vector<1x256xf32>
    %38 = vector.extract_strided_slice %35 {offsets = [2, 0], sizes = [1, 256], strides = [1, 1]} : vector<4x256xf32> to vector<1x256xf32>
    %39 = vector.extract_strided_slice %35 {offsets = [3, 0], sizes = [1, 256], strides = [1, 1]} : vector<4x256xf32> to vector<1x256xf32>
    %c0_9 = arith.constant 0 : index
    %c0_10 = arith.constant 0 : index
    %40 = vector.load %arg4[%c0_9, %c0_10] : memref<24x9xf32, #tpu.memory_space<vmem>>, vector<24x9xf32>
    %c1_i32 = arith.constant 1 : i32
    %41 = tpu.dynamic_rotate %34 by %c1_i32 dim 1 : vector<24x256xf32>, i32 -> vector<24x256xf32>
    %42 = vector.broadcast %36 : vector<1x256xf32> to vector<24x256xf32>
    %43 = arith.mulf %41, %42 : vector<24x256xf32>
    %c255_i32 = arith.constant 255 : i32
    %44 = tpu.dynamic_rotate %34 by %c255_i32 dim 1 : vector<24x256xf32>, i32 -> vector<24x256xf32>
    %45 = vector.broadcast %37 : vector<1x256xf32> to vector<24x256xf32>
    %46 = arith.mulf %44, %45 : vector<24x256xf32>
    %47 = vector.extract_strided_slice %40 {offsets = [0, 0], sizes = [24, 1], strides = [1, 1]} : vector<24x9xf32> to vector<24x1xf32>
    %48 = vector.broadcast %47 : vector<24x1xf32> to vector<24x256xf32>
    %49 = arith.mulf %48, %43 : vector<24x256xf32>
    %50 = vector.extract_strided_slice %40 {offsets = [0, 1], sizes = [24, 1], strides = [1, 1]} : vector<24x9xf32> to vector<24x1xf32>
    %51 = vector.broadcast %50 : vector<24x1xf32> to vector<24x256xf32>
    %52 = arith.mulf %51, %34 : vector<24x256xf32>
    %53 = arith.addf %49, %52 : vector<24x256xf32>
    %54 = vector.extract_strided_slice %40 {offsets = [0, 2], sizes = [24, 1], strides = [1, 1]} : vector<24x9xf32> to vector<24x1xf32>
    %55 = vector.broadcast %54 : vector<24x1xf32> to vector<24x256xf32>
    %56 = arith.mulf %55, %46 : vector<24x256xf32>
    %57 = arith.addf %53, %56 : vector<24x256xf32>
    %58 = vector.extract_strided_slice %40 {offsets = [0, 3], sizes = [24, 1], strides = [1, 1]} : vector<24x9xf32> to vector<24x1xf32>
    %59 = vector.broadcast %58 : vector<24x1xf32> to vector<24x256xf32>
    %60 = arith.mulf %59, %43 : vector<24x256xf32>
    %61 = vector.extract_strided_slice %40 {offsets = [0, 4], sizes = [24, 1], strides = [1, 1]} : vector<24x9xf32> to vector<24x1xf32>
    %62 = vector.broadcast %61 : vector<24x1xf32> to vector<24x256xf32>
    %63 = arith.mulf %62, %34 : vector<24x256xf32>
    %64 = arith.addf %60, %63 : vector<24x256xf32>
    %65 = vector.extract_strided_slice %40 {offsets = [0, 5], sizes = [24, 1], strides = [1, 1]} : vector<24x9xf32> to vector<24x1xf32>
    %66 = vector.broadcast %65 : vector<24x1xf32> to vector<24x256xf32>
    %67 = arith.mulf %66, %46 : vector<24x256xf32>
    %68 = arith.addf %64, %67 : vector<24x256xf32>
    %69 = vector.extract_strided_slice %40 {offsets = [0, 6], sizes = [24, 1], strides = [1, 1]} : vector<24x9xf32> to vector<24x1xf32>
    %70 = vector.broadcast %69 : vector<24x1xf32> to vector<24x256xf32>
    %71 = arith.mulf %70, %43 : vector<24x256xf32>
    %72 = vector.extract_strided_slice %40 {offsets = [0, 7], sizes = [24, 1], strides = [1, 1]} : vector<24x9xf32> to vector<24x1xf32>
    %73 = vector.broadcast %72 : vector<24x1xf32> to vector<24x256xf32>
    %74 = arith.mulf %73, %34 : vector<24x256xf32>
    %75 = arith.addf %71, %74 : vector<24x256xf32>
    %76 = vector.extract_strided_slice %40 {offsets = [0, 8], sizes = [24, 1], strides = [1, 1]} : vector<24x9xf32> to vector<24x1xf32>
    %77 = vector.broadcast %76 : vector<24x1xf32> to vector<24x256xf32>
    %78 = arith.mulf %77, %46 : vector<24x256xf32>
    %79 = arith.addf %75, %78 : vector<24x256xf32>
    %c16_i32 = arith.constant 16 : i32
    %80 = tpu.dynamic_rotate %57 by %c16_i32 dim 1 : vector<24x256xf32>, i32 -> vector<24x256xf32>
    %81 = vector.broadcast %38 : vector<1x256xf32> to vector<24x256xf32>
    %82 = arith.mulf %80, %81 : vector<24x256xf32>
    %83 = arith.addf %68, %82 : vector<24x256xf32>
    %c240_i32 = arith.constant 240 : i32
    %84 = tpu.dynamic_rotate %79 by %c240_i32 dim 1 : vector<24x256xf32>, i32 -> vector<24x256xf32>
    %85 = vector.broadcast %39 : vector<1x256xf32> to vector<24x256xf32>
    %86 = arith.mulf %84, %85 : vector<24x256xf32>
    %87 = arith.addf %83, %86 : vector<24x256xf32>
    %c0_11 = arith.constant 0 : index
    %c0_12 = arith.constant 0 : index
    %88 = vector.load %arg5[%c0_11, %c0_12] : memref<24x1xf32, #tpu.memory_space<vmem>>, vector<24x1xf32>
    %89 = vector.broadcast %88 : vector<24x1xf32> to vector<24x256xf32>
    %90 = arith.addf %87, %89 : vector<24x256xf32>
    %cst_13 = arith.constant 0.000000e+00 : f32
    %cst_14 = arith.constant 6.000000e+00 : f32
    %91 = vector.broadcast %cst_13 : f32 to vector<24x256xf32>
    %92 = arith.maximumf %91, %90 : vector<24x256xf32>
    %93 = vector.broadcast %cst_14 : f32 to vector<24x256xf32>
    %94 = arith.minimumf %93, %92 : vector<24x256xf32>
    %c0_15 = arith.constant 0 : index
    %c0_16 = arith.constant 0 : index
    %95 = vector.load %arg6[%c0_15, %c0_16] : memref<4x24xf32, #tpu.memory_space<vmem>>, vector<4x24xf32>
    %cst_17 = arith.constant dense<0.000000e+00> : vector<4x256xf32>
    %96 = tpu.matmul %95, %94, %cst_17 {dimension_numbers = #tpu.dot_dimension_numbers<[1], [0], [0], [1], [0, 0, 1, 1], [], []>} : vector<4x24xf32>, vector<24x256xf32>, vector<4x256xf32> -> vector<4x256xf32>
    %c0_18 = arith.constant 0 : index
    %c0_19 = arith.constant 0 : index
    %97 = vector.load %arg7[%c0_18, %c0_19] : memref<4x1xf32, #tpu.memory_space<vmem>>, vector<4x1xf32>
    %98 = vector.broadcast %97 : vector<4x1xf32> to vector<4x256xf32>
    %99 = arith.addf %96, %98 : vector<4x256xf32>
    %100 = arith.extf %1 : vector<4x256xbf16> to vector<4x256xf32>
    %101 = arith.addf %99, %100 : vector<4x256xf32>
    %c0_20 = arith.constant 0 : index
    %c0_21 = arith.constant 0 : index
    %c0_22 = arith.constant 0 : index
    %102 = vector.load %arg9[%c0_20, %c0_21, %c0_22] : memref<1x4x256xf32, #tpu.memory_space<vmem>>, vector<1x4x256xf32>
    %103 = vector.shape_cast %102 : vector<1x4x256xf32> to vector<4x256xf32>
    %104 = vector.shape_cast %101 : vector<4x256xf32> to vector<1x4x256xf32>
    tpu.vector_store %arg9[%c0_20, %c0_21, %c0_22], %104 {strides = array<i32>} : memref<1x4x256xf32, #tpu.memory_space<vmem>>, vector<1x4x256xf32>,
    return
  }
  func.func @transform_0(%arg0: i32) -> (i32, i32, i32) {
    %c0_i32 = arith.constant 0 : i32
    %c0_i32_0 = arith.constant 0 : i32
    %c0_i32_1 = arith.constant 0 : i32
    return %arg0, %c0_i32, %c0_i32_0 : i32, i32, i32
  }
  func.func @transform_1(%arg0: i32) -> (i32, i32) {
    %c0_i32 = arith.constant 0 : i32
    %c0_i32_0 = arith.constant 0 : i32
    %c0_i32_1 = arith.constant 0 : i32
    return %c0_i32, %c0_i32_0 : i32, i32
  }
  func.func @transform_2(%arg0: i32) -> (i32, i32) {
    %c0_i32 = arith.constant 0 : i32
    %c0_i32_0 = arith.constant 0 : i32
    %c0_i32_1 = arith.constant 0 : i32
    return %c0_i32, %c0_i32_0 : i32, i32
  }
  func.func @transform_3(%arg0: i32) -> (i32, i32) {
    %c0_i32 = arith.constant 0 : i32
    %c0_i32_0 = arith.constant 0 : i32
    %c0_i32_1 = arith.constant 0 : i32
    return %c0_i32, %c0_i32_0 : i32, i32
  }
  func.func @transform_4(%arg0: i32) -> (i32, i32) {
    %c0_i32 = arith.constant 0 : i32
    %c0_i32_0 = arith.constant 0 : i32
    %c0_i32_1 = arith.constant 0 : i32
    return %c0_i32, %c0_i32_0 : i32, i32
  }
  func.func @transform_5(%arg0: i32) -> (i32, i32) {
    %c0_i32 = arith.constant 0 : i32
    %c0_i32_0 = arith.constant 0 : i32
    %c0_i32_1 = arith.constant 0 : i32
    return %c0_i32, %c0_i32_0 : i32, i32
  }
  func.func @transform_6(%arg0: i32) -> (i32, i32) {
    %c0_i32 = arith.constant 0 : i32
    %c0_i32_0 = arith.constant 0 : i32
    %c0_i32_1 = arith.constant 0 : i32
    return %c0_i32, %c0_i32_0 : i32, i32
  }
  func.func @transform_7(%arg0: i32) -> (i32, i32) {
    %c0_i32 = arith.constant 0 : i32
    %c0_i32_0 = arith.constant 0 : i32
    %c0_i32_1 = arith.constant 0 : i32
    return %c0_i32, %c0_i32_0 : i32, i32
  }
  func.func @transform_8(%arg0: i32) -> (i32, i32, i32) {
    %c0_i32 = arith.constant 0 : i32
    %c0_i32_0 = arith.constant 0 : i32
    %c0_i32_1 = arith.constant 0 : i32
    return %arg0, %c0_i32, %c0_i32_0 : i32, i32, i32
  }
}

</mosaic_0001>

<bundles_post_ra>
// kernel: tpu_custom_call.1
= control target key start
LH: loop header
LB: loop body
LE: loop exit
PB: predicated region body
PF: predicated region fallthrough
CT: control target
= control target key end

     0   :  { %13 = vsyncpa [#allocation3], 0  ;;  %s1860_s0 = inlined_call_operand.vmem [shape: bf16[2,4,256], index: 0, kind: input, shape index: {}]   ;;  %s1861_s1 = inlined_call_operand.vmem [shape: bf16[24,4], index: 1, kind: input, shape index: {}]   ;;  %s1862_s2 = inlined_call_operand.vmem [shape: f32[24,1], index: 2, kind: input, shape index: {}]   ;;  %s1863_s3 = inlined_call_operand.vmem [shape: f32[24,9], index: 3, kind: input, shape index: {}]   ;;  %s1864_s4 = inlined_call_operand.vmem [shape: f32[24,1], index: 4, kind: input, shape index: {}]   ;;  %s1865_s5 = inlined_call_operand.vmem [shape: f32[4,24], index: 5, kind: input, shape index: {}]   ;;  %s1866_s6 = inlined_call_operand.vmem [shape: f32[4,1], index: 6, kind: input, shape index: {}]   ;;  %s1867_s7 = inlined_call_operand.vmem [shape: f32[4,256], index: 7, kind: input, shape index: {}]   ;;  %s1868_s8 = inlined_call_operand.hbm [shape: f32[2,4,256], index: 8, kind: output, shape index: {}]  }
   0x1   :  { %15 = vsyncpa [#allocation3 + $0x1], 0  ;;  %s1352_s27 = smov 0   ;;  %s1354_s28 = smov 0  }
   0x2   :  { %s1356_s29 = smov 0   ;;  %s1358_s30 = smov 0  }
   0x3 LB: > { %s1373_s9 = sadd.s32 4294967295, %s1290_s30   ;;  %s1107_s10 = sadd.s32 4294967294, %s1290_s30   ;;  %s1290_s30 = sphi %s1358_s30, %s1874_s30   ;;  %s1286_s29 = sphi %s1356_s29, %s1873_s29   ;;  %s1282_s28 = sphi %s1354_s28, %s1872_s28   ;;  %s1278_s27 = sphi %s1352_s27, %s1871_s27  }
   0x4   : > { %s1377_s11 = sadd.s32 1, %s1290_s30   ;;  %s201_s12 = sadd.s32 1, %s1286_s29 }
   0x5   : > { %s198_s13 = ssub.s32 %s1290_s30, %s1377_s11  ;;  %p211_p0 = scmp.ne.s32.totalorder %s1286_s29, %s1282_s28 }
   0x6   : > { %p199_p1 = scmp.eq.s32.totalorder %s198_s13, 0  ;;  %p212_p2 = scmp.eq.s32.totalorder %s1373_s9, 1 }
   0x7   : > { %p217_p3 = scmp.ne.s32.totalorder %s1282_s28, %s1278_s27  ;;  %p218_p4 = scmp.eq.s32.totalorder %s1107_s10, 1 }
   0x8   : > { %s1388_s14 = scalar_select %p199_p1, %s1286_s29, %s201_s12  }
   0x9   : > { %p1390_p5 = por %p212_p2, %p211_p0  ;;  %p1394_p6 = por %p218_p4, %p217_p3 }
   0xa   : > { %p1110_p7 = scmp.ge.s32.totalorder %s1290_s30, 1  ;;  %p265_p8 = scmp.lt.s32.totalorder %s1290_s30, 3 }
   0xc   : > { %p266_p9 = pnand %p1110_p7, %p265_p8 }
   0xd   : > { %p299_p10 = scmp.lt.s32.totalorder (!%p266_p9), %s1373_s9, 1  ;;  %s1299_s25 = smov (!%p266_p9), 1  }
   0xe   : > { %269 = sbr.rel (%p266_p9) target bundleno = 684 (0x2ac), region = 52  ;;  %s1300_s26 = smov (!%p266_p9), 127  }
   0xf   : > { %s296_s12 = sand.u32 (!%p266_p9), 1, %s1282_s28   ;;  %s1121_s17 = sshll.u32 (!%p266_p9), %s1373_s9, 7 }
  0x10   : > { %s1111_s13 = sshll.u32 (!%p266_p9), %s296_s12, 3  ;;  %s1046_s22 = scalar_lea.hbm (!%p266_p9), %s1868_s8, %s1121_s17 }
  0x11   : > { %s298_s18 = scalar_lea.vmem (!%p266_p9), [#allocation2], %s1111_s13  ;;  %s1034_s23 = scalar_lea.sflag (!%p266_p9), [#allocation3], %s296_s12 }
  0x12   : > { %s1048_s19 = sshll.u32 (!%p266_p9), %s298_s18, 4  ;;  %s1049_s19 = int_to_ptr.vmem [resolvable:$true] %s1048_s19 }
  0x13   : > { %v1123_v0 = vld [vmem:[%s1861_s1] sm:$0xff]   ;;  %v308_v1 = vld [vmem:[%s1861_s1 + $0x8] sm:$0xf]  ;;  %v1292_v2 = vmov 2   ;;  %v1293_v3 = vmov 0   ;;  %v1294_v8 = vmov 1   ;;  %v328_v19 = vlaneseq }
  0x14   : > { %1191 = vset.pattern.permute.xlu1 %v1292_v2  ;;  %1179 = vset.pattern.permute.xlu0 %v1293_v3  ;;  %v1125_v4 = vunpack.c.h.bf16 %v1123_v0  ;;  %v311_v5 = vunpack.c.l.bf16 %v308_v1  ;;  %v1124_v7 = vunpack.c.l.bf16 %v1123_v0  ;;  %v1295_v9 = vmov 3   ;;  %v480_v10 = vld [vmem:[%s1862_s2 + $0x10] sm:$0xff]  ;;  %v1423_v12 = vld [vmem:[%s1863_s3 + $0x8] sm:$0xff]  ;;  %v1433_v14 = vld [vmem:[%s1863_s3] sm:$0xff]  ;;  %s300_s20 = scalar_select %p299_p10, %s1373_s9, 1 }
  0x15   : > { %v1416_v11 = vld [vmem:[%s1863_s3 + $0x10] sm:$0xff]  ;;  %v479_v13 = vld [vmem:[%s1862_s2 + $0x8] sm:$0xff]  ;;  %v478_v15 = vld [vmem:[%s1862_s2] sm:$0xff]  ;;  %v1296_v16 = vmov 6   ;;  %v1297_v17 = vmov 8   ;;  %v1298_v18 = vmov 7  }
  0x16   : > { %v1192_v6 = vpack.i.bf16 %v1125_v4, %v311_v5  ;;  %s1120_s21 = sshll.u32 %s300_s20, 2  ;;  %v1460_v20 = vshrl.u32 %v328_v19, 7  ;;  %s1303_s20 = smov 16   ;;  %vm949_vm4 = vcmask 195584  }
  0x17   : > { %s303_s24 = scalar_lea.vmem %s1860_s0, %s1120_s21  ;;  %s1304_s21 = smov 112  }
  0x18   : > { %1193 = vperm.xlu1 %1191, %v1192_v6   ;;  %1181 = vperm.xlu0 %1179, %v1192_v6   ;;  %v304_v21 = vld [vmem:[%s303_s24] sm:$0xf]  ;;  %v1463_v22 = vsub.s32 0, %v1460_v20  ;;  %v334_v23 = vsub.s32 4, %v1460_v20  ;;  %v1467_v24 = vsub.s32 1, %v1460_v20  ;;  %v370_v25 = vsub.s32 5, %v1460_v20 }
  0x19   : > { %v1471_v26 = vsub.s32 2, %v1460_v20  ;;  %v412_v27 = vsub.s32 6, %v1460_v20  ;;  %v1474_v28 = vunpack.c.l.bf16 %v304_v21  ;;  %v1492_v37 = vsub.s32 3, %v1460_v20  ;;  %s1230_s24 = scalar_lea.vmem %s1049_s19, 128 }
  0x1a   : > { %v454_v38 = vsub.s32 7, %v1460_v20  ;;  %p1231_p11 = scmp.ne.s32.totalorder %s1049_s19, %s1230_s24 }
  0x1b   : > { %v331_v31 = vrot.slane %v1474_v28, %v1463_v22  ;;  %v335_v32 = vrot.slane %v1474_v28, %v334_v23  ;;  %v367_v33 = vrot.slane %v1474_v28, %v1467_v24  ;;  %v371_v34 = vrot.slane %v1474_v28, %v370_v25 }
  0x1c   : > { %1197 = vset.pattern.permute.xlu1 %v1293_v3  ;;  %1185 = vset.pattern.permute.xlu0 %v1294_v8  ;;  %v409_v35 = vrot.slane %v1474_v28, %v1471_v26  ;;  %v413_v36 = vrot.slane %v1474_v28, %v412_v27  ;;  %v451_v48 = vrot.slane %v1474_v28, %v1492_v37  ;;  %p1232_p12 = pnand %p1231_p11, %p1390_p5 }
  0x1d   : > { %1187 = vperm.xlu0 %1185, %v1192_v6   ;;  %314 = vperm.xlu1 %1197, %v1124_v7   ;;  %v341_v40 = vrot.slane %v331_v31, %v1463_v22  ;;  %v345_v41 = vrot.slane %v335_v32, %v1463_v22  ;;  %v377_v42 = vrot.slane %v367_v33, %v1467_v24 }
  0x1e   : > { %v381_v43 = vrot.slane %v371_v34, %v1467_v24  ;;  %v419_v44 = vrot.slane %v409_v35, %v1471_v26  ;;  %v423_v45 = vrot.slane %v413_v36, %v1471_v26  ;;  %v455_v49 = vrot.slane %v1474_v28, %v454_v38  ;;  %p1233_p13 = pneg %p1232_p12 }
  0x1f   : > { %v461_v58 = vrot.slane %v451_v48, %v1492_v37 }
  0x20   : > { %v465_v59 = vrot.slane %v455_v49, %v1492_v37 }
  0x21   : > { %1199 = vset.pattern.permute.xlu0 %v1295_v9  ;;  %1198 = vset.pattern.permute.xlu1 %v1294_v8 }
  0x22   : > { %1201 = vperm.xlu0 %1199, %v1192_v6   ;;  %353 = vperm.xlu1 %1198, %v1124_v7  }
  0x26   : > { %1207 = vset.pattern.permute.xlu0 %v1293_v3  ;;  %1205 = vset.pattern.permute.xlu1 %v1292_v2 }
  0x27   : > { %493 = vperm.xlu0 %1207, %v480_v10   ;;  %395 = vperm.xlu1 %1205, %v1124_v7  }
  0x2b   : > { %619 = vperm.xlu0 %1207, %v1416_v11   ;;  %1206 = vset.pattern.permute.xlu1 %v1295_v9 }
  0x2c   : > { %437 = vperm.xlu1 %1206, %v1124_v7  }
  0x2f   : > { %614 = vperm.xlu0 %1207, %v1423_v12  }
  0x30   : > { %1208 = vset.pattern.permute.xlu1 %v1293_v3 }
  0x31   : > { %488 = vperm.xlu1 %1208, %v479_v13  }
  0x33   : > { %609 = vperm.xlu0 %1207, %v1433_v14  }
  0x35   : > { %483 = vperm.xlu1 %1208, %v478_v15  }
  0x37   : > { %1214 = vset.pattern.permute.xlu0 %v1296_v16 }
  0x38   : > { %747 = vperm.xlu0 %1214, %v1423_v12  }
  0x39   : > { %1209 = vset.pattern.permute.xlu1 %v1294_v8 }
  0x3a   : > { %637 = vperm.xlu1 %1209, %v1416_v11  }
  0x3c   : > { %1215 = vset.pattern.permute.xlu0 %v1292_v2 }
  0x3d   : > { %661 = vperm.xlu0 %1215, %v1416_v11  }
  0x3e   : > { %633 = vperm.xlu1 %1209, %v1423_v12  }
  0x41   : > { %653 = vperm.xlu0 %1215, %v1433_v14  }
  0x42   : > { %1210 = vset.pattern.permute.xlu1 %v1296_v16 }
  0x43   : > { %751 = vperm.xlu1 %1210, %v1416_v11  }
  0x45   : > { %1220 = vset.pattern.permute.xlu0 %v1297_v17 }
  0x46   : > { %789 = vperm.xlu0 %1220, %v1423_v12  }
  0x47   : > { %1211 = vset.pattern.permute.xlu1 %v1298_v18 }
  0x48   : > { %769 = vperm.xlu1 %1211, %v1416_v11  }
  0x4c   : > { %1212 = vset.pattern.permute.xlu1 %v1294_v8 }
  0x4d   : > { %629 = vperm.xlu1 %1212, %v1433_v14  }
  0x51   : > { %1213 = vset.pattern.permute.xlu1 %v1292_v2 }
  0x52   : > { %657 = vperm.xlu1 %1213, %v1423_v12  }
  0x56   : > { %1216 = vset.pattern.permute.xlu1 %v1298_v18 }
  0x57   : > { %765 = vperm.xlu1 %1216, %v1423_v12  }
  0x5b   : > { %1217 = vset.pattern.permute.xlu1 %v1297_v17 }
  0x5c   : > { %793 = vperm.xlu1 %1217, %v1416_v11  }
  0x60   : > { %1218 = vset.pattern.permute.xlu1 %v1296_v16 }
  0x61   : > { %743 = vperm.xlu1 %1218, %v1433_v14  }
  0x65   : > { %1219 = vset.pattern.permute.xlu1 %v1298_v18 }
  0x66   : > { %761 = vperm.xlu1 %1219, %v1433_v14  }
  0x6a   : > { %1221 = vset.pattern.permute.xlu1 %v1295_v9 }
  0x93   : > { %v1194_v29 = vpop.permute.xlu1 %1193  ;;  %v1182_v30 = vpop.permute.xlu0 %1181 }
  0x94   : > { %v1183_v39 = vunpack.i.l.bf16 %v1182_v30  ;;  %v1195_v50 = vunpack.i.l.bf16 %v1194_v29  ;;  %v1184_v54 = vunpack.i.h.bf16 %v1182_v30  ;;  %v1196_v16 = vunpack.i.h.bf16 %v1194_v29 }
  0x96   : > { %v350_v51 = vmul.f32 %v1183_v39, %v341_v40  ;;  %v351_v52 = vmul.f32 %v1183_v39, %v345_v41  ;;  %v428_v60 = vmul.f32 %v1195_v50, %v419_v44  ;;  %v429_v61 = vmul.f32 %v1195_v50, %v423_v45 }
  0x97   : > { %v348_v2 = vmul.f32 %v1184_v54, %v341_v40  ;;  %v349_v4 = vmul.f32 %v1184_v54, %v345_v41  ;;  %v426_v36 = vmul.f32 %v1196_v16, %v419_v44  ;;  %v427_v39 = vmul.f32 %v1196_v16, %v423_v45 }
  0x98   : > { %v1188_v46 = vpop.permute.xlu0 %1187  ;;  %v315_v47 = vpop.permute.xlu1 %314 }
  0x99   : > { %v1189_v53 = vunpack.i.l.bf16 %v1188_v46  ;;  %v1190_v55 = vunpack.i.h.bf16 %v1188_v46 }
  0x9b   : > { %v386_v56 = vmul.f32 %v1189_v53, %v377_v42  ;;  %v387_v57 = vmul.f32 %v1189_v53, %v381_v43  ;;  %v384_v6 = vmul.f32 %v1190_v55, %v377_v42  ;;  %v385_v7 = vmul.f32 %v1190_v55, %v381_v43 }
  0x9c   : > { %v346_v55 = vmul.f32 %v341_v40, %v315_v47 }
  0x9d   : > { %v392_v62 = vadd.f32 %v386_v56, %v350_v51  ;;  %v393_v63 = vadd.f32 %v387_v57, %v351_v52  ;;  %v1202_v0 = vpop.permute.xlu0 %1201  ;;  %v354_v1 = vpop.permute.xlu1 %353  ;;  %v390_v31 = vadd.f32 %v384_v6, %v348_v2  ;;  %v391_v32 = vadd.f32 %v385_v7, %v349_v4 }
  0x9e   : > { %v1203_v5 = vunpack.i.l.bf16 %v1202_v0  ;;  %v1204_v33 = vunpack.i.h.bf16 %v1202_v0  ;;  %v382_v46 = vmul.f32 %v377_v42, %v354_v1  ;;  %v383_v48 = vmul.f32 %v381_v43, %v354_v1 }
  0x9f   : > { %v434_v8 = vadd.f32 %v428_v60, %v392_v62  ;;  %v435_v10 = vadd.f32 %v429_v61, %v393_v63  ;;  %v432_v54 = vadd.f32 %v426_v36, %v390_v31  ;;  %v433_v29 = vadd.f32 %v427_v39, %v391_v32  ;;  %v908_v31 = vld [vmem:[%s1864_s4 + $0x10] sm:$0xff]  ;;  %v907_v32 = vld [vmem:[%s1864_s4 + $0x8] sm:$0xff] }
  0xa0   : > { %v470_v13 = vmul.f32 %v1203_v5, %v461_v58  ;;  %v471_v15 = vmul.f32 %v1203_v5, %v465_v59  ;;  %v468_v51 = vmul.f32 %v1204_v33, %v461_v58  ;;  %v469_v52 = vmul.f32 %v1204_v33, %v465_v59 }
  0xa1   : > { %v347_v56 = vmul.f32 %v345_v41, %v315_v47  ;;  %v388_v63 = vadd.f32 %v382_v46, %v346_v55 }
  0xa2   : > { %v494_v17 = vpop.permute.xlu0 %493  ;;  %v476_v18 = vadd.f32 %v470_v13, %v434_v8  ;;  %v477_v21 = vadd.f32 %v471_v15, %v435_v10  ;;  %v396_v30 = vpop.permute.xlu1 %395  ;;  %v474_v1 = vadd.f32 %v468_v51, %v432_v54  ;;  %v475_v40 = vadd.f32 %v469_v52, %v433_v29 }
  0xa3   : > { %v424_v61 = vmul.f32 %v419_v44, %v396_v30  ;;  %v425_v62 = vmul.f32 %v423_v45, %v396_v30  ;;  %v389_v0 = vadd.f32 %v383_v48, %v347_v56  ;;  %v1302_v30 = vmov 5  }
  0xa4   : > { %v500_v34 = vadd.f32 %v494_v17, %v476_v18  ;;  %v501_v35 = vadd.f32 %v494_v17, %v477_v21  ;;  %v1301_v21 = vmov 4   ;;  %v1589_v29 = vand.u32 127, %v328_v19 }
  0xa5   : > { %v430_v47 = vadd.f32 %v424_v61, %v388_v63  ;;  %v431_v2 = vadd.f32 %v425_v62, %v389_v0 }
  0xa6   : > { %v506_v49 = vmax.f32 %v500_v34, 0.0  ;;  %v507_v50 = vmax.f32 %v501_v35, 0.0  ;;  %v620_v34 = vpop.permute.xlu0 %619  ;;  %vm532_vm0 = vcmp.lt.s32.totalorder %v1589_v29, 1  ;;  %vm576_vm1 = vcmp.lt.s32.totalorder %v1589_v29, 127 }
  0xa7   : > { %v438_v53 = vpop.permute.xlu1 %437  ;;  %vm820_vm2 = vcmp.lt.s32.totalorder %v1589_v29, 16  ;;  %vm869_vm3 = vcmp.lt.s32.totalorder %v1589_v29, 112 }
  0xa8   : > { %v1508_v57 = vmin.f32 %v506_v49, 6.0  ;;  %v1510_v60 = vmin.f32 %v507_v50, 6.0  ;;  %v466_v42 = vmul.f32 %v461_v58, %v438_v53  ;;  %v467_v43 = vmul.f32 %v465_v59, %v438_v53  ;;  %v1584_v53 = vld [vmem:[%s1867_s7] sm:$0xff] }
  0xa9   : > { %v543_v55 = vrot.slane %v1584_v53, %v1463_v22  ;;  %v547_v56 = vrot.slane %v1584_v53, %v334_v23  ;;  %v590_v23 = vrot.slane %v1584_v53, %v370_v25 }
  0xaa   : > { %528 = vrot.lane.b32.xlu1 %v1510_v60, %s1299_s25  ;;  %522 = vrot.lane.b32.xlu0 %v1508_v57, %s1299_s25  ;;  %v472_v6 = vadd.f32 %v466_v42, %v430_v47  ;;  %v473_v7 = vadd.f32 %v467_v43, %v431_v2  ;;  %v586_v43 = vrot.slane %v1584_v53, %v1467_v24 }
  0xab   : > { %v553_v63 = vrot.slane %v543_v55, %v1463_v22  ;;  %v1599_v0 = vrot.slane %v547_v56, %v1463_v22  ;;  %v1620_v2 = vrot.slane %v590_v23, %v1467_v24 }
  0xac   : > { %v489_v41 = vpop.permute.xlu1 %488  ;;  %v1617_v47 = vrot.slane %v586_v43, %v1467_v24 }
  0xad   : > { %v498_v4 = vadd.f32 %v489_v41, %v474_v1  ;;  %v499_v5 = vadd.f32 %v489_v41, %v475_v40 }
  0xaf   : > { %v504_v44 = vmax.f32 %v498_v4, 0.0  ;;  %v505_v45 = vmax.f32 %v499_v5, 0.0 }
  0xb0   : > { %v484_v8 = vpop.permute.xlu1 %483 }
  0xb1   : > { %v1516_v10 = vmin.f32 %v504_v44, 6.0  ;;  %v1518_v13 = vmin.f32 %v505_v45, 6.0  ;;  %v496_v15 = vadd.f32 %v484_v8, %v472_v6  ;;  %v497_v16 = vadd.f32 %v484_v8, %v473_v7 }
  0xb3   : > { %526 = vrot.lane.b32.xlu1 %v1518_v13, %s1299_s25  ;;  %520 = vrot.lane.b32.xlu0 %v1516_v10, %s1299_s25  ;;  %v502_v58 = vmax.f32 %v496_v15, 0.0  ;;  %v503_v59 = vmax.f32 %v497_v16, 0.0 }
  0xb5   : > { %v1526_v17 = vmin.f32 %v502_v58, 6.0  ;;  %v1528_v18 = vmin.f32 %v503_v59, 6.0 }
  0xb7   : > { %574 = vrot.lane.b32.xlu1 %v1510_v60, %s1300_s26  ;;  %568 = vrot.lane.b32.xlu0 %v1508_v57, %s1300_s26 }
  0xbb   : > { %524 = vrot.lane.b32.xlu1 %v1528_v18, %s1299_s25  ;;  %518 = vrot.lane.b32.xlu0 %v1526_v17, %s1299_s25  ;;  %s1306_s25 = smov [#allocation2]  }
  0xbc   : > { %s1234_s9 = sshll.u32 %s1306_s25, 4  ;;  %s1235_s9 = int_to_ptr.vmem [resolvable:$false] %s1234_s9 }
  0xbd   : > { %p1237_p0 = scmp.lt.s32.totalorder %s1049_s19, %s1235_s9 }
  0xbf   : > { %572 = vrot.lane.b32.xlu1 %v1518_v13, %s1300_s26  ;;  %566 = vrot.lane.b32.xlu0 %v1516_v10, %s1300_s26 }
  0xc3   : > { %564 = vrot.lane.b32.xlu1 %v1526_v17, %s1300_s26  ;;  %785 = vperm.xlu0 %1220, %v1433_v14  }
  0xc7   : > { %570 = vrot.lane.b32.xlu1 %v1528_v18, %s1300_s26  ;;  %1222 = vset.pattern.permute.xlu0 %v1301_v21  ;;  %s1236_s26 = scalar_lea.vmem %s1235_s9, 256 }
  0xc8   : > { %703 = vperm.xlu0 %1222, %v1416_v11   ;;  %p1238_p1 = scmp.lt.s32.totalorder %s1236_s26, %s1230_s24 }
  0xca   : > { %p1239_p2 = por %p1238_p1, %p1237_p0 }
  0xcb   : > { %685 = vperm.xlu1 %1221, %v1416_v11  }
  0xcc   : > { %1224 = vset.pattern.permute.xlu0 %v1302_v30  ;;  %p1240_p3 = pnand %p1239_p2, %p1233_p13 }
  0xcd   : > { %727 = vperm.xlu0 %1224, %v1416_v11   ;;  %v638_v11 = vpop.permute.xlu1 %637 }
  0xce   : > { %v644_v24 = vmul.f32 %v638_v11, %v1508_v57  ;;  %v645_v15 = vmul.f32 %v638_v11, %v1510_v60 }
  0xcf   : > { %681 = vperm.xlu1 %1221, %v1423_v12  }
  0xd1   : > { %723 = vperm.xlu0 %1224, %v1423_v12  }
  0xd3   : > { %1223 = vset.pattern.permute.xlu1 %v1301_v21 }
  0xd4   : > { %699 = vperm.xlu1 %1223, %v1423_v12   ;;  %v1557_v12 = vpop.permute.xlu1 %633 }
  0xd5   : > { %1228 = vset.pattern.permute.xlu0 %v1293_v3 }
  0xd6   : > { %921 = vperm.xlu0 %1228, %v908_v31  }
  0xd8   : > { %1225 = vset.pattern.permute.xlu1 %v1295_v9  ;;  %v1559_v33 = vpop.permute.xlu1 %751  ;;  %v615_v9 = vpop.permute.xlu0 %614 }
  0xd9   : > { %677 = vperm.xlu1 %1225, %v1433_v14  }
  0xda   : > { %916 = vperm.xlu0 %1228, %v907_v32  }
  0xdc   : > { %v1561_v35 = vpop.permute.xlu1 %769  ;;  %v1565_v39 = vpop.permute.xlu0 %609 }
  0xdd   : > { %1226 = vset.pattern.permute.xlu1 %v1301_v21 }
  0xde   : > { %695 = vperm.xlu1 %1226, %v1433_v14  }
  0xe0   : > { %v1563_v36 = vpop.permute.xlu1 %629  ;;  %v1569_v48 = vpop.permute.xlu0 %747 }
  0xe2   : > { %1227 = vset.pattern.permute.xlu1 %v1302_v30 }
  0xe3   : > { %719 = vperm.xlu1 %1227, %v1433_v14  }
  0xe4   : > { %v1567_v46 = vpop.permute.xlu1 %657 }
  0xe7   : > { %1229 = vset.pattern.permute.xlu1 %v1293_v3  ;;  %v662_v3 = vpop.permute.xlu0 %661 }
  0xe8   : > { %v1571_v14 = vpop.permute.xlu1 %765 }
  0xeb   : > { %v1575_v50 = vpop.permute.xlu0 %653 }
  0xec   : > { %v1573_v49 = vpop.permute.xlu1 %793 }
  0xef   : > { %v1579_v52 = vpop.permute.xlu0 %789 }
  0xf0   : > { %v1577_v51 = vpop.permute.xlu1 %743 }
  0xf4   : > { %v1586_v54 = vpop.permute.xlu1 %761 }
 0x11c   : > { %v529_v61 = vpop.permute.xlu1 %528  ;;  %v523_v62 = vpop.permute.xlu0 %522 }
 0x11d   : > { %v535_v19 = vsel %vm532_vm0, %v523_v62, %v529_v61  ;;  %v538_v42 = vsel %vm532_vm0, %v529_v61, %v523_v62 }
 0x11e   : > { %v1610_v1 = vmul.f32 %v553_v63, %v538_v42  ;;  %v1613_v40 = vmul.f32 %v1599_v0, %v535_v19  ;;  %v642_v42 = vmul.f32 %v1557_v12, %v1516_v10 }
 0x120   : > { %v626_v4 = vmul.f32 %v620_v34, %v1610_v1  ;;  %v627_v5 = vmul.f32 %v620_v34, %v1613_v40 }
 0x122   : > { %v651_v32 = vadd.f32 %v645_v15, %v627_v5  ;;  %v650_v55 = vadd.f32 %v644_v24, %v626_v4 }
 0x125   : > { %v527_v22 = vpop.permute.xlu1 %526  ;;  %v521_v41 = vpop.permute.xlu0 %520 }
 0x126   : > { %v534_v25 = vsel %vm532_vm0, %v521_v41, %v527_v22  ;;  %v537_v44 = vsel %vm532_vm0, %v527_v22, %v521_v41  ;;  %v643_v22 = vmul.f32 %v1557_v12, %v1518_v13  ;;  %v758_v12 = vmul.f32 %v1559_v33, %v1610_v1 }
 0x127   : > { %v1640_v59 = vmul.f32 %v553_v63, %v537_v44  ;;  %v1643_v21 = vmul.f32 %v1599_v0, %v534_v25  ;;  %v759_v25 = vmul.f32 %v1559_v33, %v1613_v40 }
 0x129   : > { %v575_v45 = vpop.permute.xlu1 %574  ;;  %v569_v6 = vpop.permute.xlu0 %568  ;;  %v624_v62 = vmul.f32 %v615_v9, %v1640_v59  ;;  %v625_v19 = vmul.f32 %v615_v9, %v1643_v21 }
 0x12a   : > { %v579_v7 = vsel %vm576_vm1, %v569_v6, %v575_v45  ;;  %v582_v8 = vsel %vm576_vm1, %v575_v45, %v569_v6 }
 0x12b   : > { %v1635_v16 = vmul.f32 %v1617_v47, %v579_v7  ;;  %v1638_v58 = vmul.f32 %v1620_v2, %v582_v8  ;;  %v649_v44 = vadd.f32 %v643_v22, %v625_v19  ;;  %v648_v45 = vadd.f32 %v642_v42, %v624_v62 }
 0x12d   : > { %v525_v30 = vpop.permute.xlu1 %524  ;;  %v519_v31 = vpop.permute.xlu0 %518  ;;  %v669_v34 = vmul.f32 %v662_v3, %v1638_v58  ;;  %v668_v56 = vmul.f32 %v662_v3, %v1635_v16  ;;  %v801_v33 = vmul.f32 %v1573_v49, %v1638_v58 }
 0x12e   : > { %v536_v3 = vsel %vm532_vm0, %v525_v30, %v519_v31  ;;  %v533_v6 = vsel %vm532_vm0, %v519_v31, %v525_v30  ;;  %v756_v31 = vmul.f32 %v1569_v48, %v1640_v59 }
 0x12f   : > { %v675_v11 = vadd.f32 %v669_v34, %v651_v32  ;;  %v674_v61 = vadd.f32 %v668_v56, %v650_v55  ;;  %v1673_v7 = vmul.f32 %v553_v63, %v536_v3  ;;  %v777_v32 = vmul.f32 %v1561_v35, %v1510_v60 }
 0x130   : > { %v776_v34 = vmul.f32 %v1561_v35, %v1508_v57  ;;  %v800_v63 = vmul.f32 %v1573_v49, %v1635_v16  ;;  %v1690_v56 = vmul.f32 %v1599_v0, %v533_v6  ;;  %v774_v49 = vmul.f32 %v1571_v14, %v1516_v10 }
 0x131   : > { %v573_v43 = vpop.permute.xlu1 %572  ;;  %818 = vrot.lane.b32.xlu1 %v675_v11, %s1303_s20  ;;  %v567_v23 = vpop.permute.xlu0 %566  ;;  %812 = vrot.lane.b32.xlu0 %v674_v61, %s1303_s20  ;;  %v640_v11 = vmul.f32 %v1563_v36, %v1526_v17  ;;  %v622_v61 = vmul.f32 %v1565_v39, %v1673_v7 }
 0x132   : > { %v578_v41 = vsel %vm576_vm1, %v567_v23, %v573_v43  ;;  %v581_v9 = vsel %vm576_vm1, %v573_v43, %v567_v23  ;;  %v782_v35 = vadd.f32 %v776_v34, %v758_v12  ;;  %v755_v12 = vmul.f32 %v1577_v51, %v1690_v56 }
 0x133   : > { %v1662_v4 = vmul.f32 %v1617_v47, %v578_v41  ;;  %v1665_v5 = vmul.f32 %v1620_v2, %v581_v9  ;;  %v623_v41 = vmul.f32 %v1565_v39, %v1690_v56  ;;  %v780_v9 = vadd.f32 %v774_v49, %v756_v31 }
 0x134   : > { %v806_v22 = vadd.f32 %v800_v63, %v782_v35 }
 0x135   : > { %v565_v8 = vpop.permute.xlu1 %564  ;;  %v667_v24 = vmul.f32 %v1567_v46, %v1665_v5  ;;  %v666_v15 = vmul.f32 %v1567_v46, %v1662_v4  ;;  %v783_v46 = vadd.f32 %v777_v32, %v759_v25  ;;  %v798_v3 = vmul.f32 %v1579_v52, %v1662_v4 }
 0x136   : > { %v641_v25 = vmul.f32 %v1563_v36, %v1528_v18  ;;  %v757_v36 = vmul.f32 %v1569_v48, %v1643_v21  ;;  %v799_v63 = vmul.f32 %v1579_v52, %v1665_v5  ;;  %v943_v48 = vld [vmem:[%s1866_s6] sm:$0xf] }
 0x137   : > { %v673_v55 = vadd.f32 %v667_v24, %v649_v44  ;;  %v672_v30 = vadd.f32 %v666_v15, %v648_v45  ;;  %v807_v42 = vadd.f32 %v801_v33, %v783_v46  ;;  %v773_v44 = vmul.f32 %v1586_v54, %v1528_v18 }
 0x138   : > { %v804_v6 = vadd.f32 %v798_v3, %v780_v9  ;;  %v647_v32 = vadd.f32 %v641_v25, %v623_v41  ;;  %v906_v9 = vld [vmem:[%s1864_s4] sm:$0xff] }
 0x139   : > { %v571_v62 = vpop.permute.xlu1 %570  ;;  %816 = vrot.lane.b32.xlu1 %v673_v55, %s1303_s20  ;;  %810 = vrot.lane.b32.xlu0 %v672_v30, %s1303_s20  ;;  %v779_v15 = vadd.f32 %v773_v44, %v755_v12  ;;  %v775_v30 = vmul.f32 %v1571_v14, %v1518_v13 }
 0x13a   : > { %v577_v0 = vsel %vm576_vm1, %v565_v8, %v571_v62  ;;  %v580_v19 = vsel %vm576_vm1, %v571_v62, %v565_v8  ;;  %v772_v62 = vmul.f32 %v1586_v54, %v1526_v17 }
 0x13b   : > { %v1705_v43 = vmul.f32 %v1617_v47, %v577_v0  ;;  %v1708_v23 = vmul.f32 %v1620_v2, %v580_v19  ;;  %v646_v47 = vadd.f32 %v640_v11, %v622_v61  ;;  %v781_v46 = vadd.f32 %v775_v30, %v757_v36 }
 0x13d   : > { %867 = vrot.lane.b32.xlu1 %v807_v42, %s1304_s21  ;;  %861 = vrot.lane.b32.xlu0 %v806_v22, %s1304_s21  ;;  %v664_v2 = vmul.f32 %v1575_v50, %v1705_v43  ;;  %v665_v24 = vmul.f32 %v1575_v50, %v1708_v23  ;;  %v754_v50 = vmul.f32 %v1577_v51, %v1673_v7 }
 0x13e   : > { %v786_v39 = vpop.permute.xlu0 %785  ;;  %v805_v49 = vadd.f32 %v799_v63, %v781_v46 }
 0x13f   : > { %v797_v45 = vmul.f32 %v786_v39, %v1708_v23  ;;  %v670_v8 = vadd.f32 %v664_v2, %v646_v47  ;;  %v671_v55 = vadd.f32 %v665_v24, %v647_v32  ;;  %v796_v35 = vmul.f32 %v786_v39, %v1705_v43 }
 0x140   : > { %v1305_v24 = vmov 0.0  }
 0x141   : > { %859 = vrot.lane.b32.xlu0 %v804_v6, %s1304_s21  ;;  %808 = vrot.lane.b32.xlu1 %v670_v8, %s1303_s20  ;;  %v803_v33 = vadd.f32 %v797_v45, %v779_v15 }
 0x142   : > { %1017 = vmatprep.mubr.f32.mxu0 %v1305_v24 }
 0x143   : > { %v704_v34 = vpop.permute.xlu0 %703 }
 0x144   : > { %v710_v11 = vmul.f32 %v704_v34, %v1508_v57  ;;  %v711_v14 = vmul.f32 %v704_v34, %v1510_v60  ;;  %v778_v57 = vadd.f32 %v772_v62, %v754_v50  ;;  %v879_v50 = vrot.slane %v1584_v53, %v1492_v37 }
 0x145   : > { %863 = vrot.lane.b32.xlu0 %v803_v33, %s1304_s21  ;;  %814 = vrot.lane.b32.xlu1 %v671_v55, %s1303_s20 }
 0x146   : > { %v686_v31 = vpop.permute.xlu1 %685  ;;  %v802_v3 = vadd.f32 %v796_v35, %v778_v57 }
 0x147   : > { %v692_v61 = vmul.f32 %v686_v31, %v1610_v1  ;;  %v693_v52 = vmul.f32 %v686_v31, %v1613_v40  ;;  %v883_v31 = vrot.slane %v1584_v53, %v454_v38 }
 0x148   : > { %v728_v51 = vpop.permute.xlu0 %727 }
 0x149   : > { %v716_v0 = vadd.f32 %v710_v11, %v692_v61  ;;  %v717_v19 = vadd.f32 %v711_v14, %v693_v52  ;;  %v734_v42 = vmul.f32 %v728_v51, %v1635_v16  ;;  %v735_v22 = vmul.f32 %v728_v51, %v1638_v58  ;;  %946 = vperm.xlu0 %1228, %v943_v48  }
 0x14a   : > { %865 = vrot.lane.b32.xlu1 %v805_v49, %s1304_s21  ;;  %v682_v60 = vpop.permute.xlu1 %681  ;;  %v893_v52 = vrot.slane %v883_v31, %v1492_v37 }
 0x14b   : > { %v740_v1 = vadd.f32 %v734_v42, %v716_v0  ;;  %v741_v40 = vadd.f32 %v735_v22, %v717_v19  ;;  %v690_v16 = vmul.f32 %v682_v60, %v1640_v59  ;;  %v691_v58 = vmul.f32 %v682_v60, %v1643_v21 }
 0x14c   : > { %v724_v54 = vpop.permute.xlu0 %723 }
 0x14d   : > { %v732_v2 = vmul.f32 %v724_v54, %v1662_v4  ;;  %v733_v25 = vmul.f32 %v724_v54, %v1665_v5 }
 0x14e   : > { %857 = vrot.lane.b32.xlu1 %v802_v3, %s1304_s21 }
 0x14f   : > { %v700_v41 = vpop.permute.xlu1 %699 }
 0x150   : > { %v708_v12 = vmul.f32 %v700_v41, %v1516_v10  ;;  %v709_v47 = vmul.f32 %v700_v41, %v1518_v13 }
 0x151   : > { %v922_v30 = vpop.permute.xlu0 %921 }
 0x152   : > { %v714_v44 = vadd.f32 %v708_v12, %v690_v16  ;;  %v715_v39 = vadd.f32 %v709_v47, %v691_v58  ;;  %911 = vperm.xlu1 %1229, %v906_v9  }
 0x154   : > { %v1762_v45 = vadd.f32 %v732_v2, %v714_v44  ;;  %v1764_v6 = vadd.f32 %v733_v25, %v715_v39  ;;  %v678_v8 = vpop.permute.xlu1 %677 }
 0x155   : > { %v688_v13 = vmul.f32 %v678_v8, %v1673_v7  ;;  %v689_v4 = vmul.f32 %v678_v8, %v1690_v56  ;;  %v917_v63 = vpop.permute.xlu0 %916 }
 0x159   : > { %v696_v59 = vpop.permute.xlu1 %695 }
 0x15a   : > { %v706_v21 = vmul.f32 %v696_v59, %v1526_v17  ;;  %v707_v10 = vmul.f32 %v696_v59, %v1528_v18  ;;  %v830_v17 = vrot.slane %v1584_v53, %v1471_v26  ;;  %v834_v18 = vrot.slane %v1584_v53, %v412_v27 }
 0x15c   : > { %v712_v15 = vadd.f32 %v706_v21, %v688_v13  ;;  %v713_v32 = vadd.f32 %v707_v10, %v689_v4 }
 0x15e   : > { %v720_v5 = vpop.permute.xlu1 %719 }
 0x15f   : > { %v730_v36 = vmul.f32 %v720_v5, %v1705_v43  ;;  %v731_v33 = vmul.f32 %v720_v5, %v1708_v23  ;;  %v840_v43 = vrot.slane %v830_v17, %v1471_v26  ;;  %v844_v23 = vrot.slane %v834_v18, %v1471_v26 }
 0x160   : > { %v889_v26 = vrot.slane %v879_v50, %v1492_v37 }
 0x161   : > { %v1772_v34 = vadd.f32 %v730_v36, %v712_v15  ;;  %v1774_v55 = vadd.f32 %v731_v33, %v713_v32 }
 0x1a3   : > { %v819_v7 = vpop.permute.xlu1 %818  ;;  %v813_v56 = vpop.permute.xlu0 %812 }
 0x1a4   : > { %v823_v48 = vsel %vm820_vm2, %v813_v56, %v819_v7  ;;  %v826_v27 = vsel %vm820_vm2, %v819_v7, %v813_v56 }
 0x1a5   : > { %v849_v14 = vmul.f32 %v840_v43, %v826_v27  ;;  %v850_v61 = vmul.f32 %v844_v23, %v823_v48 }
 0x1a7   : > { %v855_v35 = vadd.f32 %v849_v14, %v740_v1  ;;  %v856_v51 = vadd.f32 %v850_v61, %v741_v40 }
 0x1ab   : > { %v817_v46 = vpop.permute.xlu1 %816  ;;  %v811_v11 = vpop.permute.xlu0 %810 }
 0x1ac   : > { %v822_v37 = vsel %vm820_vm2, %v811_v11, %v817_v46  ;;  %v825_v3 = vsel %vm820_vm2, %v817_v46, %v811_v11 }
 0x1ad   : > { %v847_v1 = vmul.f32 %v840_v43, %v825_v3  ;;  %v848_v40 = vmul.f32 %v844_v23, %v822_v37 }
 0x1af   : > { %v868_v62 = vpop.permute.xlu1 %867  ;;  %v862_v20 = vpop.permute.xlu0 %861  ;;  %v853_v44 = vadd.f32 %v847_v1, %v1762_v45  ;;  %v854_v39 = vadd.f32 %v848_v40, %v1764_v6 }
 0x1b0   : > { %v872_v38 = vsel %vm869_vm3, %v862_v20, %v868_v62  ;;  %v875_v53 = vsel %vm869_vm3, %v868_v62, %v862_v20  ;;  %v1024_v62 = vcombine.high %v1474_v28, %v1474_v28 }
 0x1b1   : > { %v898_v49 = vmul.f32 %v889_v26, %v872_v38  ;;  %v899_v0 = vmul.f32 %v893_v52, %v875_v53 }
 0x1b3   : > { %v809_v19 = vpop.permute.xlu1 %808  ;;  %v905_v42 = vadd.f32 %v899_v0, %v856_v51  ;;  %v904_v22 = vadd.f32 %v898_v49, %v855_v35  ;;  %v860_v12 = vpop.permute.xlu0 %859 }
 0x1b5   : > { %v929_v57 = vadd.f32 %v922_v30, %v905_v42  ;;  %v928_v60 = vadd.f32 %v922_v30, %v904_v22 }
 0x1b7   : > { %v815_v54 = vpop.permute.xlu1 %814  ;;  %v935_v41 = vmax.f32 %v929_v57, 0.0  ;;  %v934_v9 = vmax.f32 %v928_v60, 0.0  ;;  %v864_v32 = vpop.permute.xlu0 %863 }
 0x1b8   : > { %v821_v5 = vsel %vm820_vm2, %v809_v19, %v815_v54  ;;  %v824_v15 = vsel %vm820_vm2, %v815_v54, %v809_v19 }
 0x1b9   : > { %v941_v16 = vmin.f32 %v935_v41, 6.0  ;;  %v940_v58 = vmin.f32 %v934_v9, 6.0  ;;  %v845_v30 = vmul.f32 %v840_v43, %v824_v15  ;;  %v846_v17 = vmul.f32 %v844_v23, %v821_v5 }
 0x1bb   : > { %979 = vmatprep.subr.mxu0 %v941_v16  ;;  %v851_v50 = vadd.f32 %v845_v30, %v1772_v34  ;;  %v852_v31 = vadd.f32 %v846_v17, %v1774_v55 }
 0x1bc   : > { %v866_v47 = vpop.permute.xlu1 %865  ;;  %980 = vmatpush1.msra.mxu0 %v940_v58 }
 0x1bd   : > { %v871_v2 = vsel %vm869_vm3, %v860_v12, %v866_v47  ;;  %v874_v25 = vsel %vm869_vm3, %v866_v47, %v860_v12 }
 0x1be   : > { %v896_v8 = vmul.f32 %v889_v26, %v871_v2  ;;  %v897_v24 = vmul.f32 %v893_v52, %v874_v25 }
 0x1c0   : > { %v902_v59 = vadd.f32 %v896_v8, %v853_v44  ;;  %v903_v21 = vadd.f32 %v897_v24, %v854_v39  ;;  %v858_v10 = vpop.permute.xlu1 %857 }
 0x1c1   : > { %v870_v45 = vsel %vm869_vm3, %v858_v10, %v864_v32  ;;  %v873_v6 = vsel %vm869_vm3, %v864_v32, %v858_v10 }
 0x1c2   : > { %v927_v13 = vadd.f32 %v917_v63, %v903_v21  ;;  %v926_v4 = vadd.f32 %v917_v63, %v902_v59  ;;  %v894_v63 = vmul.f32 %v889_v26, %v870_v45  ;;  %v895_v56 = vmul.f32 %v893_v52, %v873_v6  ;;  %v942_v26 = vld [vmem:[%s1865_s5] sm:$0xf] }
 0x1c4   : > { %v933_v36 = vmax.f32 %v927_v13, 0.0  ;;  %v932_v33 = vmax.f32 %v926_v4, 0.0  ;;  %v900_v48 = vadd.f32 %v894_v63, %v851_v50  ;;  %v901_v27 = vadd.f32 %v895_v56, %v852_v31  ;;  %v947_v34 = vpop.permute.xlu0 %946 }
 0x1c6   : > { %v939_v18 = vmin.f32 %v933_v36, 6.0  ;;  %v938_v7 = vmin.f32 %v932_v33, 6.0 }
 0x1c8   : > { %981 = vmatprep.subr.mxu0 %v939_v18 }
 0x1c9   : > { %982 = vmatpush1.msra.mxu0 %v938_v7 }
 0x1cd   : > { %v912_v46 = vpop.permute.xlu1 %911 }
 0x1ce   : > { %v924_v11 = vadd.f32 %v912_v46, %v900_v48  ;;  %v925_v14 = vadd.f32 %v912_v46, %v901_v27 }
 0x1d0   : > { %v930_v29 = vmax.f32 %v924_v11, 0.0  ;;  %v931_v61 = vmax.f32 %v925_v14, 0.0 }
 0x1d2   : > { %v936_v43 = vmin.f32 %v930_v29, 6.0  ;;  %v937_v23 = vmin.f32 %v931_v61, 6.0 }
 0x1d4   : > { %983 = vmatprep.subr.mxu0 %v937_v23 }
 0x1d5   : > { %984 = vmatpush1.msra.mxu0 %v936_v43 }
 0x1d6   : > { %1114 = vmatmul.mubr.msk.f32.vlgmr.msra.gmra.mxu0 %vm949_vm4, %v942_v26 }
 0x296   : > { %v1019_v55 = vpop.f32.mrf.mxu0 }
 0x297   : > { %v1020_v52 = vadd.f32 %v1019_v55, %v947_v34 }
 0x298   : > { %v1021_v20 = vpop.f32.mrf.mxu0 }
 0x299   : > { %v1022_v38 = vadd.f32 %v1021_v20, %v947_v34  ;;  %v1026_v53 = vadd.f32 %v1020_v52, %v1474_v28 }
 0x29b   : > { %v1027_v35 = vadd.f32 %v1024_v62, %v1022_v38 }
 0x29d   : > { %v1030_v51 = vcombine.low %v1026_v53, %v1027_v35 }
 0x29f   : > { %1032 = vst [vmem:[%s298_s18] sm:$0xff] %v1030_v51 }
 0x2a0   : > { %1243 = shalt.err (!%p1240_p3)
}
 0x2a1   : > { %s1244_s10 = scalar_lea.hbm %s1046_s22, 128  ;;  %s1248_s17 = scalar_lea.hbm %s1868_s8, 256 }
 0x2a2   : > { %p1245_p4 = scmp.ne.s32.totalorder %s1046_s22, %s1244_s10  ;;  %p1249_p9 = scmp.lt.s32.totalorder %s1046_s22, %s1868_s8 }
 0x2a3   : > { %p1250_p10 = scmp.lt.s32.totalorder %s1248_s17, %s1244_s10 }
 0x2a4   : > { %p1246_p7 = pnand %p1245_p4, %p1390_p5 }
 0x2a5   : > { %p1251_p11 = por %p1250_p10, %p1249_p9 }
 0x2a6   : > { %p1247_p8 = pneg %p1246_p7 }
 0x2a8   : > { %p1252_p12 = pnand %p1251_p11, %p1247_p8 }
 0x2aa   : > { %1255 = shalt.err (!%p1252_p12)
}
 0x2ab   : > { %1126 = dma.vmem_to_hbm [thread:$0]  (%p1390_p5), %s1049_s19, 128, %s1046_s22, %s1034_s23  }
 0x2ac PF: > { %p1132_p13 = scmp.ge.s32.totalorder %s1290_s30, 2  ;;  %s1060_s21 = sand.u32 1, %s1278_s27  }
 0x2ad   : > { %s1061_s24 = scalar_lea.sflag [#allocation3], %s1060_s21 }
 0x2ae   : > { %p1129_p0 = pnand %p1132_p13, %p1394_p6 }
 0x2b0   : > { %p1130_p1 = pneg %p1129_p0 }
 0x2b2   : > { %1273 = dma.done.wait (%p1130_p1), %s1061_s24, 128  }
 0x2b3   : > { %1275 = vsyncadd (%p1130_p1), %s1061_s24, 4294967168  ;;  %p18_p2 = scmp.ge.s32.totalorder %s1377_s11, 4   ;;  %s1871_s27 = smov %s1282_s28 }
 0x2b4   : > { %s1872_s28 = smov %s1286_s29  ;;  %s1873_s29 = smov %s1388_s14 }
 0x2b5   : > { %s1874_s30 = smov %s1377_s11  ;;  %20 = sbr.rel (!%p18_p2) target bundleno = 3 (0x3), region = 87 }
 0x2ba   :  { %1066 = vsyncpa [#allocation3], 1 }
 0x2bb   :  { %1068 = vsyncpa [#allocation3 + $0x1], 1 }

</bundles_post_ra>
